<compile_context>
chip_gen: v5e
topology: v5e:2x2
jax: 0.10.0
libtpu: 0.0.40
codegen_flags: <defaults>
</compile_context>

<pallas_src>
import jax
import jax.numpy as jnp
from jax.experimental import pallas as pl
from jax.experimental.pallas import tpu as pltpu


# --------------------------------------------------------------------------
# Helpers
# --------------------------------------------------------------------------

def _round_up(x, m):
    return ((x + m - 1) // m) * m


def _tpu_vmem_and_multicore():
    """(VMEM bytes per core, is v7x-class with 2 TensorCores)."""
    try:
        info = pltpu.get_tpu_info()
        vmem = int(getattr(info, "vmem_capacity_bytes"))
        return vmem, vmem <= (64 << 20)          # 64 MiB/TC => v7x-class
    except Exception:
        return 64 << 20, False                   # conservative budget, 1 core


def _largest_aligned_divisor(dim, target, align):
    """Largest t <= min(target, dim) with t % align == 0 and dim % t == 0."""
    if dim % align:
        return None
    t = (min(target, dim) // align) * align
    while t >= align:
        if dim % t == 0:
            return t
        t -= align
    return None


def _choose_tile(dim, target, aligns, min_frac=4):
    """Pick (tile, padded_dim) for one axis.

    Preference: (1) whole dim in one tile (minimal padding to alignment),
    (2) an aligned divisor of dim that is >= target/min_frac (no padding),
    (3) pad dim up to a multiple of the aligned target tile."""
    min_align = aligns[-1]
    small = _round_up(dim, min_align)
    if small <= target:
        return small, small
    for align in aligns:
        t = _largest_aligned_divisor(dim, target, align)
        if t is not None and t * min_frac >= target:
            return t, dim
    t = max((target // aligns[0]) * aligns[0], aligns[0])
    return t, _round_up(dim, t)


# --------------------------------------------------------------------------
# Wrapper
# --------------------------------------------------------------------------

def simple_gemm(a, b, *, force_tiled=False):
    """Computes a @ b with a Pallas TPU kernel. a: [M, K], b: [K, N] -> [M, N]."""
    M, K = a.shape
    K2, N = b.shape
    assert K == K2, f"inner dims mismatch: {K} vs {K2}"

    out_dtype = jnp.result_type(a.dtype, b.dtype)
    acc_dtype = jnp.int32 if jnp.issubdtype(out_dtype, jnp.integer) else jnp.float32

    a_bytes = jnp.dtype(a.dtype).itemsize
    b_bytes = jnp.dtype(b.dtype).itemsize
    o_bytes = jnp.dtype(out_dtype).itemsize
    in_bytes = max(a_bytes, b_bytes)

    # ---- Kernels (closures over acc_dtype). ----
    def _kernel_single_block(a_ref, b_ref, o_ref):
        o_ref[...] = jnp.dot(a_ref[...], b_ref[...],
                             preferred_element_type=acc_dtype).astype(o_ref.dtype)

    def _kernel_direct(a_ref, b_ref, o_ref):
        # K fully resident (one k step): single matmul burst, single store.
        o_ref[...] = jnp.dot(a_ref[...], b_ref[...],
                             preferred_element_type=acc_dtype).astype(o_ref.dtype)

    def _kernel_acc_in_out(a_ref, b_ref, o_ref):
        # Wide (f32/i32) output: accumulate directly into the resident output tile.
        @pl.when(pl.program_id(2) == 0)
        def _():
            o_ref[...] = jnp.zeros_like(o_ref)
        o_ref[...] += jnp.dot(a_ref[...], b_ref[...], preferred_element_type=acc_dtype)

    def _kernel_acc_scratch(a_ref, b_ref, o_ref, acc_ref):
        # Narrow output: wide scratch accumulator, cast on the last k step.
        @pl.when(pl.program_id(2) == 0)
        def _():
            acc_ref[...] = jnp.zeros_like(acc_ref)
        acc_ref[...] += jnp.dot(a_ref[...], b_ref[...], preferred_element_type=acc_dtype)

        @pl.when(pl.program_id(2) == pl.num_programs(2) - 1)
        def _():
            o_ref[...] = acc_ref[...].astype(o_ref.dtype)

    # ---- Tiny-problem fast path: single block, no grid / pipelining. ----
    total_bytes = M * K * a_bytes + K * N * b_bytes + M * N * (o_bytes + 4)
    if total_bytes <= (4 << 20) and not force_tiled:
        cost = pl.CostEstimate(
            flops=2 * M * N * K, transcendentals=0,
            bytes_accessed=M * K * a_bytes + K * N * b_bytes + M * N * o_bytes)
        return pl.pallas_call(
            _kernel_single_block,
            out_shape=jax.ShapeDtypeStruct((M, N), out_dtype),
            cost_estimate=cost,
        )(a, b)

    # ---- Tiled path: chip- and dtype-aware tile sizes. ----
    vmem, multicore = _tpu_vmem_and_multicore()
    budget = int(0.7 * vmem)

    if vmem <= (64 << 20):                    # v7x-class: 64 MiB VMEM per TC
        tm_t, tn_t, tk_t, tn_cap = 512, 512, 512, 2048
    else:                                     # v5e / v6e: 128 MiB VMEM
        tm_t, tn_t, tk_t, tn_cap = 1024, 1024, 512, 4096
    if in_bytes <= 2:                         # bf16/fp16/int8: same bytes, 2x depth
        tk_t *= 2
        tn_cap *= 2

    # Packed sublane count for the second-to-last dim alignment.
    sub_align = {4: 8, 2: 16, 1: 32}.get(in_bytes, 8)

    tm, M_pad = _choose_tile(M, tm_t, (256, 128, sub_align))
    tn, N_pad = _choose_tile(N, min(tn_cap, max(tn_t, _round_up(min(N, tn_cap), 128))),
                             (256, 128))
    tk, K_pad = _choose_tile(K, tk_t, (256, 128))

    use_scratch = out_dtype != acc_dtype

    def _need(tm_, tn_, tk_, k_steps):
        n = 2 * tm_ * tk_ * a_bytes + 2 * tk_ * tn_ * b_bytes   # double-buffered A, B
        if k_steps == 1:
            n += 2 * tm_ * tn_ * o_bytes       # output block changes every step
        else:
            n += tm_ * tn_ * o_bytes           # output resident across k
            if use_scratch:
                n += tm_ * tn_ * jnp.dtype(acc_dtype).itemsize
        return n

    # K-resident promotion: if the full K depth (and full N) fits the budget,
    # use tk = K so B is streamed from HBM exactly once and O is written once.
    if N_pad // tn == 1:
        k_res = _round_up(K, 128)
        if _need(tm, tn, k_res, 1) <= budget:
            tk, K_pad = k_res, k_res

    # Defensive shrink (floors: tm,tn >= 256, tk >= 256; shrink tn before tm).
    for _ in range(16):
        if _need(tm, tn, tk, K_pad // tk) <= budget:
            break
        if tk > 256 and (tk // 2) % 128 == 0:
            tk //= 2
        elif tn > 256 and (tn // 2) % 128 == 0:
            tn //= 2
        elif tm > 256 and (tm // 2) % sub_align == 0:
            tm //= 2
        else:
            break

    # Megacore split: v7x only (2 TensorCores). Split M (no redundant HBM traffic).
    if multicore and (M_pad // tm) * (N_pad // tn) == 1:
        if tm >= 256 and (tm // 2) % sub_align == 0:
            tm //= 2

    # Zero-pad inputs to tile multiples (zeros don't change the product).
    if (M_pad, K_pad) != (M, K):
        a = jnp.pad(a, ((0, M_pad - M), (0, K_pad - K)))
    if (K_pad, N_pad) != (K, N):
        b = jnp.pad(b, ((0, K_pad - K), (0, N_pad - N)))

    grid = (M_pad // tm, N_pad // tn, K_pad // tk)
    k_steps = grid[2]

    if k_steps == 1:
        kernel, scratch_shapes = _kernel_direct, []
    elif not use_scratch:
        kernel, scratch_shapes = _kernel_acc_in_out, []
    else:
        kernel, scratch_shapes = _kernel_acc_scratch, [pltpu.VMEM((tm, tn), acc_dtype)]

    need = _need(tm, tn, tk, k_steps)
    vmem_limit = int(min(int(0.9 * vmem),
                         max(int(1.3 * need) + (4 << 20), 32 << 20)))

    # Real HBM traffic: A is re-read per j block, B per i block.
    cost = pl.CostEstimate(
        flops=2 * M_pad * N_pad * K_pad,
        transcendentals=0,
        bytes_accessed=(M_pad * K_pad * a_bytes) * grid[1]
                       + (K_pad * N_pad * b_bytes) * grid[0]
                       + M_pad * N_pad * o_bytes)

    out = pl.pallas_call(
        kernel,
        out_shape=jax.ShapeDtypeStruct((M_pad, N_pad), out_dtype),
        grid_spec=pltpu.PrefetchScalarGridSpec(
            num_scalar_prefetch=0,
            grid=grid,
            in_specs=[
                pl.BlockSpec((tm, tk), lambda i, j, k: (i, k)),
                pl.BlockSpec((tk, tn), lambda i, j, k: (k, j)),
            ],
            out_specs=pl.BlockSpec((tm, tn), lambda i, j, k: (i, j)),
            scratch_shapes=scratch_shapes,
        ),
        compiler_params=pltpu.CompilerParams(
            dimension_semantics=("parallel", "parallel", "arbitrary"),
            vmem_limit_bytes=vmem_limit,
        ),
        cost_estimate=cost,
    )(a, b)

    if (M_pad, N_pad) != (M, N):
        out = out[:M, :N]
    return out


# --------------------------------------------------------------------------
# Self-test
# --------------------------------------------------------------------------

if __name__ == "__main__":
    key = jax.random.PRNGKey(0)
    k1, k2, k3, k4, k5, k6, k7, k8 = jax.random.split(key, 8)

    # 1) Small shapes (SimpleGemm.forward(A, B)): exercises the single-block path.
    M, K, N = 128, 256, 128
    A = jax.random.normal(k1, (M, K), dtype=jnp.float32)
    B = jax.random.normal(k2, (K, N), dtype=jnp.float32)
    out = simple_gemm(A, B)
    jax.block_until_ready(out)
    ref = jnp.matmul(A, B)
    assert out.shape == ref.shape and out.dtype == ref.dtype
    assert jnp.allclose(out, ref, atol=1e-3, rtol=1e-3), "single-block path mismatch"

    # 2) Larger f32 problem: exercises the tiled / K-resident direct-store path.
    M2, K2_, N2 = 512, 1024, 512
    A2 = jax.random.normal(k3, (M2, K2_), dtype=jnp.float32)
    B2 = jax.random.normal(k4, (K2_, N2), dtype=jnp.float32)
    out2 = simple_gemm(A2, B2)
    jax.block_until_ready(out2)
    ref2 = jnp.matmul(A2, B2)
    assert out2.shape == ref2.shape and out2.dtype == ref2.dtype
    assert jnp.allclose(out2, ref2, atol=1e-2, rtol=1e-3), "tiled f32 path mismatch"

    # 3) bf16 inputs on the tiled path (f32 accumulation, bf16 store).
    M3, K3_, N3 = 256, 512, 512
    A3 = jax.random.normal(k5, (M3, K3_), dtype=jnp.bfloat16)
    B3 = jax.random.normal(k6, (K3_, N3), dtype=jnp.bfloat16)
    out3 = simple_gemm(A3, B3, force_tiled=True)
    jax.block_until_ready(out3)
    ref3 = jnp.matmul(A3.astype(jnp.float32), B3.astype(jnp.float32)).astype(jnp.bfloat16)
    assert out3.shape == ref3.shape and out3.dtype == jnp.bfloat16
    assert jnp.allclose(out3.astype(jnp.float32), ref3.astype(jnp.float32),
                        atol=2e-1, rtol=2e-2), "tiled bf16 path mismatch"

    # 4) Awkward (non-aligned) dims: exercises the zero-padding path.
    M4, K4_, N4 = 200, 300, 260
    A4 = jax.random.normal(k7, (M4, K4_), dtype=jnp.float32)
    B4 = jax.random.normal(k8, (K4_, N4), dtype=jnp.float32)
    out4 = simple_gemm(A4, B4, force_tiled=True)
    jax.block_until_ready(out4)
    ref4 = jnp.matmul(A4, B4)
    assert out4.shape == ref4.shape and out4.dtype == ref4.dtype
    assert jnp.allclose(out4, ref4, atol=1e-2, rtol=1e-3), "padded path mismatch"

    print("KERNEL_OK")
</pallas_src>

<mosaic_0001>
module attributes {stable_mosaic.version = 11 : i64} {
  func.func @_kernel_single_block(%arg0: memref<128x256xf32, #tpu.memory_space<vmem>>, %arg1: memref<256x128xf32, #tpu.memory_space<vmem>>, %arg2: memref<128x128xf32, #tpu.memory_space<vmem>>) attributes {dimension_semantics = [], scalar_prefetch = 0 : i64, scratch_operands = 0 : i64, tpu.core_type = #tpu.core_type<tc>} {
    %c0 = arith.constant 0 : index
    %c0_0 = arith.constant 0 : index
    %0 = vector.load %arg0[%c0, %c0_0] : memref<128x256xf32, #tpu.memory_space<vmem>>, vector<128x256xf32>
    %c0_1 = arith.constant 0 : index
    %c0_2 = arith.constant 0 : index
    %1 = vector.load %arg1[%c0_1, %c0_2] : memref<256x128xf32, #tpu.memory_space<vmem>>, vector<256x128xf32>
    %cst = arith.constant dense<0.000000e+00> : vector<128x128xf32>
    %2 = tpu.matmul %0, %1, %cst {dimension_numbers = #tpu.dot_dimension_numbers<[1], [0], [0], [1], [0, 0, 1, 1], [], []>} : vector<128x256xf32>, vector<256x128xf32>, vector<128x128xf32> -> vector<128x128xf32>
    %c0_3 = arith.constant 0 : index
    %c0_4 = arith.constant 0 : index
    %3 = vector.load %arg2[%c0_3, %c0_4] : memref<128x128xf32, #tpu.memory_space<vmem>>, vector<128x128xf32>
    tpu.vector_store %arg2[%c0_3, %c0_4], %2 {strides = array<i32>} : memref<128x128xf32, #tpu.memory_space<vmem>>, vector<128x128xf32>,
    return
  }
}

</mosaic_0001>

<bundles_post_ra>
// kernel: tpu_custom_call.1
= control target key start
LH: loop header
LB: loop body
LE: loop exit
PB: predicated region body
PF: predicated region fallthrough
CT: control target
= control target key end

     0   :  { %7 = vsyncpa [#allocation3], 0  ;;  %s428_s0 = inlined_call_operand.hbm [shape: f32[128,256], index: 0, kind: input, shape index: {}]   ;;  %s429_s1 = inlined_call_operand.hbm [shape: f32[256,128], index: 1, kind: input, shape index: {}]   ;;  %s430_s2 = inlined_call_operand.hbm [shape: f32[128,128], index: 2, kind: output, shape index: {}]  }
   0x1   :  { %8 = vsyncpa [#allocation6], 0 }
   0x2   :  { %9 = vsyncpa [#allocation4], 0  ;;  %s14_s11 = sshll.u32 %s428_s0, 4  ;;  %s391_s12 = smov [#allocation2]   ;;  %s15_s11 = int_to_ptr.hbm [resolvable:$true] %s14_s11 }
   0x3   :  { %s16_s13 = sshll.u32 %s391_s12, 4  ;;  %s27_s16 = sshll.u32 %s429_s1, 4  ;;  %s17_s13 = int_to_ptr.vmem [resolvable:$true] %s16_s13  ;;  %s28_s16 = int_to_ptr.hbm [resolvable:$true] %s27_s16 }
   0x4   :  { %s392_s17 = smov 256   ;;  %s393_s18 = smov 16  }
   0x5   :  { %22 = dma.hbm_to_vmem [thread:$0]  %s15_s11, 4096, %s17_s13, [#allocation3], %s392_s17, %s392_s17, %s393_s18  }
   0x6   :  { %s394_s19 = smov [#allocation5]   ;;  %s395_s21 = smov 128  }
   0x7   :  { %s29_s20 = sshll.u32 %s394_s19, 4  ;;  %s396_s22 = smov 8   ;;  %s30_s20 = int_to_ptr.vmem [resolvable:$true] %s29_s20 }
   0x8   :  { %35 = dma.hbm_to_vmem [thread:$0]  %s28_s16, 4096, %s30_s20, [#allocation6], %s395_s21, %s395_s21, %s396_s22  }
   0x9   :  { %385 = dma.done.wait [#allocation3], 4096  }
   0xa   :  { %386 = vsyncadd [#allocation3], 4294963200 }
   0xb   :  { %387 = dma.done.wait [#allocation6], 4096  }
   0xc   :  { %388 = vsyncadd [#allocation6], 4294963200  ;;  %v91_v0 = vld [vmem:[#allocation5 + $0x78] sm:$0xff]  ;;  %v90_v2 = vld [vmem:[#allocation5 + $0x70] sm:$0xff]  ;;  %s397_s0 = smov [#allocation7]   ;;  %s260_s25 = sshll.u32 %s430_s2, 4  ;;  %s261_s25 = int_to_ptr.hbm [resolvable:$true] %s260_s25 }
   0xd   :  { %v107_v1 = vld [vmem:[#allocation5 + $0xf8] sm:$0xff]  ;;  %274 = vmatpush.msra.mxu2 %v91_v0  ;;  %v106_v3 = vld [vmem:[#allocation5 + $0xf0] sm:$0xff]  ;;  %v89_v4 = vld [vmem:[#allocation5 + $0x68] sm:$0xff]  ;;  %108 = vmatpush.msra.mxu0 %v91_v0  ;;  %s258_s1 = sshll.u32 %s397_s0, 4  ;;  %s259_s1 = int_to_ptr.vmem [resolvable:$true] %s258_s1 }
   0xe   :  { %290 = vmatpush.msra.mxu3 %v107_v1  ;;  %v105_v5 = vld [vmem:[#allocation5 + $0xe8] sm:$0xff]  ;;  %173 = vmatpush.msra.mxu1 %v107_v1  ;;  %v88_v6 = vld [vmem:[#allocation5 + $0x60] sm:$0xff]  ;;  %v87_v8 = vld [vmem:[#allocation5 + $0x58] sm:$0xff] }
   0xf   :  { %275 = vmatpush.msra.mxu2 %v90_v2  ;;  %v104_v7 = vld [vmem:[#allocation5 + $0xe0] sm:$0xff]  ;;  %109 = vmatpush.msra.mxu0 %v90_v2  ;;  %v103_v9 = vld [vmem:[#allocation5 + $0xd8] sm:$0xff]  ;;  %v86_v10 = vld [vmem:[#allocation5 + $0x50] sm:$0xff] }
  0x10   :  { %291 = vmatpush.msra.mxu3 %v106_v3  ;;  %174 = vmatpush.msra.mxu1 %v106_v3  ;;  %v102_v11 = vld [vmem:[#allocation5 + $0xd0] sm:$0xff]  ;;  %v85_v12 = vld [vmem:[#allocation5 + $0x48] sm:$0xff]  ;;  %v84_v14 = vld [vmem:[#allocation5 + $0x40] sm:$0xff] }
  0x11   :  { %276 = vmatpush.msra.mxu2 %v89_v4  ;;  %110 = vmatpush.msra.mxu0 %v89_v4  ;;  %v101_v13 = vld [vmem:[#allocation5 + $0xc8] sm:$0xff]  ;;  %v100_v15 = vld [vmem:[#allocation5 + $0xc0] sm:$0xff]  ;;  %v83_v16 = vld [vmem:[#allocation5 + $0x38] sm:$0xff] }
  0x12   :  { %292 = vmatpush.msra.mxu3 %v105_v5  ;;  %175 = vmatpush.msra.mxu1 %v105_v5  ;;  %v99_v17 = vld [vmem:[#allocation5 + $0xb8] sm:$0xff]  ;;  %v82_v18 = vld [vmem:[#allocation5 + $0x30] sm:$0xff]  ;;  %v81_v20 = vld [vmem:[#allocation5 + $0x28] sm:$0xff] }
  0x13   :  { %277 = vmatpush.msra.mxu2 %v88_v6  ;;  %111 = vmatpush.msra.mxu0 %v88_v6  ;;  %v98_v19 = vld [vmem:[#allocation5 + $0xb0] sm:$0xff]  ;;  %v97_v21 = vld [vmem:[#allocation5 + $0xa8] sm:$0xff]  ;;  %v80_v22 = vld [vmem:[#allocation5 + $0x20] sm:$0xff] }
  0x14   :  { %293 = vmatpush.msra.mxu3 %v104_v7  ;;  %176 = vmatpush.msra.mxu1 %v104_v7  ;;  %v96_v23 = vld [vmem:[#allocation5 + $0xa0] sm:$0xff]  ;;  %v79_v24 = vld [vmem:[#allocation5 + $0x18] sm:$0xff]  ;;  %v78_v26 = vld [vmem:[#allocation5 + $0x10] sm:$0xff] }
  0x15   :  { %278 = vmatpush.msra.mxu2 %v87_v8  ;;  %112 = vmatpush.msra.mxu0 %v87_v8  ;;  %v95_v25 = vld [vmem:[#allocation5 + $0x98] sm:$0xff]  ;;  %v94_v27 = vld [vmem:[#allocation5 + $0x90] sm:$0xff]  ;;  %v77_v28 = vld [vmem:[#allocation5 + $0x8] sm:$0xff] }
  0x16   :  { %294 = vmatpush.msra.mxu3 %v103_v9  ;;  %177 = vmatpush.msra.mxu1 %v103_v9  ;;  %v93_v29 = vld [vmem:[#allocation5 + $0x88] sm:$0xff]  ;;  %v76_v30 = vld [vmem:[#allocation5] sm:$0xff]  ;;  %v62_v36 = vld [vmem:[#allocation2 + $0x90] sm:$0xff] }
  0x17   :  { %279 = vmatpush.msra.mxu2 %v86_v10  ;;  %113 = vmatpush.msra.mxu0 %v86_v10  ;;  %v92_v31 = vld [vmem:[#allocation5 + $0x80] sm:$0xff]  ;;  %v61_v33 = vld [vmem:[#allocation2 + $0x88] sm:$0xff]  ;;  %v63_v37 = vld [vmem:[#allocation2 + $0x98] sm:$0xff] }
  0x18   :  { %295 = vmatpush.msra.mxu3 %v102_v11  ;;  %178 = vmatpush.msra.mxu1 %v102_v11  ;;  %v60_v32 = vld [vmem:[#allocation2 + $0x80] sm:$0xff]  ;;  %v45_v35 = vld [vmem:[#allocation2 + $0x8] sm:$0xff]  ;;  %v46_v38 = vld [vmem:[#allocation2 + $0x10] sm:$0xff] }
  0x19   :  { %280 = vmatpush.msra.mxu2 %v85_v12  ;;  %114 = vmatpush.msra.mxu0 %v85_v12  ;;  %v44_v34 = vld [vmem:[#allocation2] sm:$0xff]  ;;  %v47_v39 = vld [vmem:[#allocation2 + $0x18] sm:$0xff]  ;;  %v65_v41 = vld [vmem:[#allocation2 + $0xa8] sm:$0xff] }
  0x1a   :  { %296 = vmatpush.msra.mxu3 %v101_v13  ;;  %179 = vmatpush.msra.mxu1 %v101_v13  ;;  %v64_v40 = vld [vmem:[#allocation2 + $0xa0] sm:$0xff]  ;;  %v49_v43 = vld [vmem:[#allocation2 + $0x28] sm:$0xff]  ;;  %v66_v44 = vld [vmem:[#allocation2 + $0xb0] sm:$0xff] }
  0x1b   :  { %281 = vmatpush.msra.mxu2 %v84_v14  ;;  %115 = vmatpush.msra.mxu0 %v84_v14  ;;  %v48_v42 = vld [vmem:[#allocation2 + $0x20] sm:$0xff]  ;;  %v67_v45 = vld [vmem:[#allocation2 + $0xb8] sm:$0xff]  ;;  %v50_v46 = vld [vmem:[#allocation2 + $0x30] sm:$0xff] }
  0x1c   :  { %297 = vmatpush.msra.mxu3 %v100_v15  ;;  %180 = vmatpush.msra.mxu1 %v100_v15  ;;  %v51_v47 = vld [vmem:[#allocation2 + $0x38] sm:$0xff]  ;;  %v68_v48 = vld [vmem:[#allocation2 + $0xc0] sm:$0xff]  ;;  %v69_v49 = vld [vmem:[#allocation2 + $0xc8] sm:$0xff] }
  0x1d   :  { %282 = vmatpush.msra.mxu2 %v83_v16  ;;  %116 = vmatpush.msra.mxu0 %v83_v16  ;;  %v52_v50 = vld [vmem:[#allocation2 + $0x40] sm:$0xff]  ;;  %v53_v51 = vld [vmem:[#allocation2 + $0x48] sm:$0xff]  ;;  %v70_v52 = vld [vmem:[#allocation2 + $0xd0] sm:$0xff] }
  0x1e   :  { %298 = vmatpush.msra.mxu3 %v99_v17  ;;  %181 = vmatpush.msra.mxu1 %v99_v17  ;;  %v71_v53 = vld [vmem:[#allocation2 + $0xd8] sm:$0xff]  ;;  %v54_v54 = vld [vmem:[#allocation2 + $0x50] sm:$0xff]  ;;  %v72_v56 = vld [vmem:[#allocation2 + $0xe0] sm:$0xff] }
  0x1f   :  { %283 = vmatpush.msra.mxu2 %v82_v18  ;;  %117 = vmatpush.msra.mxu0 %v82_v18  ;;  %v55_v55 = vld [vmem:[#allocation2 + $0x58] sm:$0xff]  ;;  %v73_v57 = vld [vmem:[#allocation2 + $0xe8] sm:$0xff]  ;;  %v56_v58 = vld [vmem:[#allocation2 + $0x60] sm:$0xff] }
  0x20   :  { %299 = vmatpush.msra.mxu3 %v98_v19  ;;  %182 = vmatpush.msra.mxu1 %v98_v19  ;;  %v57_v59 = vld [vmem:[#allocation2 + $0x68] sm:$0xff]  ;;  %v74_v60 = vld [vmem:[#allocation2 + $0xf0] sm:$0xff]  ;;  %v75_v61 = vld [vmem:[#allocation2 + $0xf8] sm:$0xff] }
  0x21   :  { %284 = vmatpush.msra.mxu2 %v81_v20  ;;  %118 = vmatpush.msra.mxu0 %v81_v20  ;;  %v58_v62 = vld [vmem:[#allocation2 + $0x70] sm:$0xff]  ;;  %v59_v63 = vld [vmem:[#allocation2 + $0x78] sm:$0xff] }
  0x22   :  { %300 = vmatpush.msra.mxu3 %v97_v21  ;;  %183 = vmatpush.msra.mxu1 %v97_v21 }
  0x23   :  { %285 = vmatpush.msra.mxu2 %v80_v22  ;;  %119 = vmatpush.msra.mxu0 %v80_v22 }
  0x24   :  { %301 = vmatpush.msra.mxu3 %v96_v23  ;;  %184 = vmatpush.msra.mxu1 %v96_v23 }
  0x25   :  { %286 = vmatpush.msra.mxu2 %v79_v24  ;;  %120 = vmatpush.msra.mxu0 %v79_v24 }
  0x26   :  { %302 = vmatpush.msra.mxu3 %v95_v25  ;;  %185 = vmatpush.msra.mxu1 %v95_v25 }
  0x27   :  { %287 = vmatpush.msra.mxu2 %v78_v26  ;;  %121 = vmatpush.msra.mxu0 %v78_v26 }
  0x28   :  { %303 = vmatpush.msra.mxu3 %v94_v27  ;;  %186 = vmatpush.msra.mxu1 %v94_v27 }
  0x29   :  { %288 = vmatpush.msra.mxu2 %v77_v28  ;;  %122 = vmatpush.msra.mxu0 %v77_v28 }
  0x2a   :  { %304 = vmatpush.msra.mxu3 %v93_v29  ;;  %187 = vmatpush.msra.mxu1 %v93_v29 }
  0x2b   :  { %289 = vmatpush.msra.mxu2 %v76_v30  ;;  %123 = vmatpush.msra.mxu0 %v76_v30 }
  0x2c   :  { %305 = vmatpush.msra.mxu3 %v92_v31  ;;  %148 = vmatmul.f32.vlgmr.msra.gmra.mxu2 %v60_v32 }
  0x2d   :  { %213 = vmatmul.f32.vlgmr.msra.gmra.mxu3 %v61_v33  ;;  %188 = vmatpush.msra.mxu1 %v92_v31 }
  0x2e   :  { %124 = vmatmul.f32.vlgmr.msra.gmra.mxu0 %v44_v34  ;;  %189 = vmatmul.f32.vlgmr.msra.gmra.mxu1 %v45_v35 }
  0x34   :  { %151 = vmatmul.f32.gmra.mxu2 %v62_v36 }
  0x35   :  { %216 = vmatmul.f32.gmra.mxu3 %v63_v37 }
  0x36   :  { %127 = vmatmul.f32.gmra.mxu0 %v46_v38  ;;  %192 = vmatmul.f32.gmra.mxu1 %v47_v39 }
  0x3c   :  { %154 = vmatmul.f32.gmra.mxu2 %v64_v40 }
  0x3d   :  { %219 = vmatmul.f32.gmra.mxu3 %v65_v41 }
  0x3e   :  { %130 = vmatmul.f32.gmra.mxu0 %v48_v42  ;;  %195 = vmatmul.f32.gmra.mxu1 %v49_v43 }
  0x44   :  { %157 = vmatmul.f32.gmra.mxu2 %v66_v44 }
  0x45   :  { %222 = vmatmul.f32.gmra.mxu3 %v67_v45 }
  0x46   :  { %133 = vmatmul.f32.gmra.mxu0 %v50_v46  ;;  %198 = vmatmul.f32.gmra.mxu1 %v51_v47 }
  0x4c   :  { %160 = vmatmul.f32.gmra.mxu2 %v68_v48 }
  0x4d   :  { %225 = vmatmul.f32.gmra.mxu3 %v69_v49 }
  0x4e   :  { %136 = vmatmul.f32.gmra.mxu0 %v52_v50  ;;  %201 = vmatmul.f32.gmra.mxu1 %v53_v51 }
  0x54   :  { %163 = vmatmul.f32.gmra.mxu2 %v70_v52 }
  0x55   :  { %228 = vmatmul.f32.gmra.mxu3 %v71_v53 }
  0x56   :  { %139 = vmatmul.f32.gmra.mxu0 %v54_v54  ;;  %204 = vmatmul.f32.gmra.mxu1 %v55_v55 }
  0x5c   :  { %166 = vmatmul.f32.gmra.mxu2 %v72_v56 }
  0x5d   :  { %231 = vmatmul.f32.gmra.mxu3 %v73_v57 }
  0x5e   :  { %142 = vmatmul.f32.gmra.mxu0 %v56_v58  ;;  %207 = vmatmul.f32.gmra.mxu1 %v57_v59 }
  0x64   :  { %169 = vmatmul.f32.gmra.mxu2 %v74_v60 }
  0x65   :  { %234 = vmatmul.f32.gmra.mxu3 %v75_v61 }
  0x66   :  { %145 = vmatmul.f32.gmra.mxu0 %v58_v62  ;;  %210 = vmatmul.f32.gmra.mxu1 %v59_v63 }
  0xab   :  { %v125_v0 = vpop.f32.mrf.mxu0  ;;  %v190_v1 = vpop.f32.mrf.mxu1 }
  0xac   :  { %v191_v2 = vadd.f32 %v190_v1, %v125_v0 }
  0xae   :  { %238 = vst [vmem:[#allocation7] sm:$0xff] %v191_v2 }
  0xaf   :  { %v149_v3 = vpop.f32.mrf.mxu2 }
  0xb0   :  { %v214_v4 = vpop.f32.mrf.mxu3 }
  0xb1   :  { %v215_v5 = vadd.f32 %v214_v4, %v149_v3 }
  0xb3   :  { %246 = vst [vmem:[#allocation7 + $0x40] sm:$0xff] %v215_v5  ;;  %v128_v6 = vpop.f32.mrf.mxu0  ;;  %v193_v7 = vpop.f32.mrf.mxu1 }
  0xb4   :  { %v194_v8 = vadd.f32 %v193_v7, %v128_v6 }
  0xb6   :  { %239 = vst [vmem:[#allocation7 + $0x8] sm:$0xff] %v194_v8 }
  0xb7   :  { %v152_v9 = vpop.f32.mrf.mxu2 }
  0xb8   :  { %v217_v10 = vpop.f32.mrf.mxu3 }
  0xb9   :  { %v218_v11 = vadd.f32 %v217_v10, %v152_v9 }
  0xbb   :  { %247 = vst [vmem:[#allocation7 + $0x48] sm:$0xff] %v218_v11  ;;  %v131_v12 = vpop.f32.mrf.mxu0  ;;  %v196_v13 = vpop.f32.mrf.mxu1 }
  0xbc   :  { %v197_v14 = vadd.f32 %v196_v13, %v131_v12 }
  0xbe   :  { %240 = vst [vmem:[#allocation7 + $0x10] sm:$0xff] %v197_v14 }
  0xbf   :  { %v155_v15 = vpop.f32.mrf.mxu2 }
  0xc0   :  { %v220_v16 = vpop.f32.mrf.mxu3 }
  0xc1   :  { %v221_v17 = vadd.f32 %v220_v16, %v155_v15 }
  0xc3   :  { %248 = vst [vmem:[#allocation7 + $0x50] sm:$0xff] %v221_v17  ;;  %v134_v18 = vpop.f32.mrf.mxu0  ;;  %v199_v19 = vpop.f32.mrf.mxu1 }
  0xc4   :  { %v200_v20 = vadd.f32 %v199_v19, %v134_v18 }
  0xc6   :  { %241 = vst [vmem:[#allocation7 + $0x18] sm:$0xff] %v200_v20 }
  0xc7   :  { %v158_v21 = vpop.f32.mrf.mxu2 }
  0xc8   :  { %v223_v22 = vpop.f32.mrf.mxu3 }
  0xc9   :  { %v224_v23 = vadd.f32 %v223_v22, %v158_v21 }
  0xcb   :  { %249 = vst [vmem:[#allocation7 + $0x58] sm:$0xff] %v224_v23  ;;  %v137_v24 = vpop.f32.mrf.mxu0  ;;  %v202_v25 = vpop.f32.mrf.mxu1 }
  0xcc   :  { %v203_v26 = vadd.f32 %v202_v25, %v137_v24 }
  0xce   :  { %242 = vst [vmem:[#allocation7 + $0x20] sm:$0xff] %v203_v26 }
  0xcf   :  { %v161_v27 = vpop.f32.mrf.mxu2 }
  0xd0   :  { %v226_v28 = vpop.f32.mrf.mxu3 }
  0xd1   :  { %v227_v29 = vadd.f32 %v226_v28, %v161_v27 }
  0xd3   :  { %250 = vst [vmem:[#allocation7 + $0x60] sm:$0xff] %v227_v29  ;;  %v140_v30 = vpop.f32.mrf.mxu0  ;;  %v205_v31 = vpop.f32.mrf.mxu1 }
  0xd4   :  { %v206_v32 = vadd.f32 %v205_v31, %v140_v30 }
  0xd6   :  { %243 = vst [vmem:[#allocation7 + $0x28] sm:$0xff] %v206_v32 }
  0xd7   :  { %v164_v33 = vpop.f32.mrf.mxu2 }
  0xd8   :  { %v229_v34 = vpop.f32.mrf.mxu3 }
  0xd9   :  { %v230_v35 = vadd.f32 %v229_v34, %v164_v33 }
  0xdb   :  { %251 = vst [vmem:[#allocation7 + $0x68] sm:$0xff] %v230_v35  ;;  %v143_v36 = vpop.f32.mrf.mxu0  ;;  %v208_v37 = vpop.f32.mrf.mxu1 }
  0xdc   :  { %v209_v38 = vadd.f32 %v208_v37, %v143_v36 }
  0xde   :  { %244 = vst [vmem:[#allocation7 + $0x30] sm:$0xff] %v209_v38 }
  0xdf   :  { %v167_v39 = vpop.f32.mrf.mxu2 }
  0xe0   :  { %v232_v40 = vpop.f32.mrf.mxu3 }
  0xe1   :  { %v233_v41 = vadd.f32 %v232_v40, %v167_v39 }
  0xe3   :  { %252 = vst [vmem:[#allocation7 + $0x70] sm:$0xff] %v233_v41  ;;  %v146_v42 = vpop.f32.mrf.mxu0  ;;  %v211_v43 = vpop.f32.mrf.mxu1 }
  0xe4   :  { %v212_v44 = vadd.f32 %v211_v43, %v146_v42 }
  0xe6   :  { %245 = vst [vmem:[#allocation7 + $0x38] sm:$0xff] %v212_v44 }
  0xe7   :  { %v170_v45 = vpop.f32.mrf.mxu2 }
  0xe8   :  { %v235_v46 = vpop.f32.mrf.mxu3 }
  0xe9   :  { %v236_v47 = vadd.f32 %v235_v46, %v170_v45 }
  0xeb   :  { %253 = vst [vmem:[#allocation7 + $0x78] sm:$0xff] %v236_v47 }
  0xec   :  { %266 = dma.vmem_to_hbm [thread:$0]  %s259_s1, 2048, %s261_s25, [#allocation4], %s395_s21, %s395_s21, %s396_s22  }
  0xed   :  { %389 = dma.done.wait [#allocation4], 2048  }
  0xee   :  { %390 = vsyncadd [#allocation4], 4294965248 }
  0xef   :  { %271 = vsyncpa [#allocation3], 1 }
  0xf0   :  { %272 = vsyncpa [#allocation6], 1 }
  0xf1   :  { %273 = vsyncpa [#allocation4], 1 }

</bundles_post_ra>
